<compile_context>
chip_gen: v5e
topology: v5e:2x2
jax: 0.10.0
libtpu: 0.0.40
codegen_flags: <defaults>
</compile_context>

<pallas_src>
import math

import jax
import jax.numpy as jnp
from jax import lax
from jax.experimental import pallas as pl
from jax.experimental.pallas import tpu as pltpu


def _loss0(x):
    # binary_cross_entropy_with_logits(x, target=0) = max(x,0) + log1p(exp(-|x|))
    return jnp.maximum(x, 0.0) + jnp.log1p(jnp.exp(-jnp.abs(x)))


def _fold_sublane_groups(x):
    """Fold (T, T) -> (8, T) by summing aligned 8-row sublane groups (pairwise tree)."""
    t = x.shape[0]
    parts = [x[r * 8:(r + 1) * 8, :] for r in range(t // 8)]
    while len(parts) > 1:
        nxt = [parts[a] + parts[a + 1] for a in range(0, len(parts) - 1, 2)]
        if len(parts) % 2:
            nxt.append(parts[-1])
        parts = nxt
    return parts[0]


def _bce_bulk_kernel(zi_ref, zj_ref, out_ref, acc_ref):
    i = pl.program_id(0)
    j = pl.program_id(1)

    # Symmetry: loss0(x_ij) == loss0(x_ji) for the symmetric logits z @ z.T, so only
    # upper-triangular tiles (j >= i) are evaluated; off-diagonal tiles count twice.
    @pl.when(j >= i)
    def _active():
        @pl.when(j == i)              # first active tile of this row -> reset acc
        def _init():
            acc_ref[...] = jnp.zeros_like(acc_ref)

        zi = zi_ref[...]              # (T, D)
        zj = zj_ref[...]              # (T, D)
        # Contract the last (lane) axis of both operands -> feeds the MXU directly,
        # no transpose of z; f32 accumulation.
        logits = lax.dot_general(
            zi, zj,
            dimension_numbers=(((1,), (1,)), ((), ())),
            preferred_element_type=jnp.float32)            # (T, T) f32

        loss = _loss0(logits)                               # 2 EUP + ~4 VALU / elem
        folded = _fold_sublane_groups(loss)                 # (8, T), plain VALU adds
        factor = jnp.where(j > i, jnp.float32(2.0), jnp.float32(1.0))
        acc_ref[...] += factor * folded

        @pl.when(j == pl.num_programs(1) - 1)               # last tile of this row
        def _finalize():
            out_ref[...] = acc_ref[...]


def bce_loss(z, edge_index, *, tile=512, matmul_dtype=jnp.float32):
    """Pallas equivalent of BCELoss.forward(z, edge_index). Returns scalar f32.

    matmul_dtype=jnp.bfloat16 gives ~2x MXU throughput and halves zj DMA per step at
    reduced logit precision; float32 (default) matches the PyTorch module exactly.
    """
    n, d = z.shape
    z = z.astype(jnp.float32)

    # --- tile / pad geometry ---------------------------------------------------
    # Square, lane-dense tiles (multiple of 128); square tiles are required for the
    # transpose-symmetry doubling and keep padding to a single tile multiple.
    tile = max(128, min(int(tile), ((n + 127) // 128) * 128))
    tile = ((tile + 127) // 128) * 128
    n_pad = ((n + tile - 1) // tile) * tile
    grid = n_pad // tile

    z_pad = z if n_pad == n else jnp.pad(z, ((0, n_pad - n), (0, 0)))
    z_mm = z_pad.astype(matmul_dtype)

    # --- bulk term: sum over all n_pad^2 pairs of loss0(z_i . z_j) ---------------
    partials = pl.pallas_call(
        _bce_bulk_kernel,
        out_shape=jax.ShapeDtypeStruct((grid * 8, tile), jnp.float32),
        grid=(grid, grid),
        in_specs=[
            pl.BlockSpec((tile, d), lambda i, j: (i, 0)),   # z rows for this row tile
            pl.BlockSpec((tile, d), lambda i, j: (j, 0)),   # z rows for this col tile
        ],
        out_specs=pl.BlockSpec((8, tile), lambda i, j: (i, 0)),
        scratch_shapes=[pltpu.VMEM((8, tile), jnp.float32)],
        compiler_params=pltpu.CompilerParams(
            dimension_semantics=("parallel", "arbitrary")),
    )(z_mm, z_mm)
    bulk = jnp.sum(partials)
    if n_pad != n:
        # zero-padded rows/cols give logits exactly 0 -> each padded pair contributes
        # loss0(0) = log(2); subtract analytically (no masking in the kernel).
        pad_pairs = jnp.float32(n_pad * n_pad - n * n)
        bulk = bulk - pad_pairs * jnp.log1p(jnp.float32(1.0))

    # --- scalar weights (hoisted out of the kernel) -----------------------------
    numel = jnp.float32(n) * jnp.float32(n)
    e = int(edge_index.shape[1])
    if e > 0:
        src = edge_index[0].astype(jnp.int32)
        dst = edge_index[1].astype(jnp.int32)
        # Dedup duplicate edges (adjacency scatter collapses them to 1) via a 2-key
        # lexsort -- no src*n+dst key, so no int32 overflow for large n.
        order = jnp.lexsort((dst, src))
        ss = src[order]
        ds = dst[order]
        is_uniq = jnp.concatenate(
            [jnp.ones((1,), dtype=bool),
             (ss[1:] != ss[:-1]) | (ds[1:] != ds[:-1])])
        pos = jnp.sum(is_uniq.astype(jnp.float32))          # = adj.sum()
    else:
        pos = jnp.float32(0.0)
    neg = numel - pos
    inv_pos = jnp.where(pos > 0, 1.0 / pos, 0.0)
    inv_neg = jnp.where(neg > 0, 1.0 / neg, 0.0)

    # --- O(E*D) edge correction (plain-JAX glue, not the hot path) --------------
    if e > 0:
        x_e = jnp.sum(z[ss] * z[ds], axis=-1)               # edge logits
        l0_e = _loss0(x_e)
        corr = jnp.where(is_uniq, inv_pos * (l0_e - x_e) - inv_neg * l0_e, 0.0)
        edge_term = jnp.sum(corr)
    else:
        edge_term = jnp.float32(0.0)

    return (inv_neg * bulk + edge_term) / numel


def bce_loss_ref(z, edge_index):
    """Pure-JAX reference (direct translation of the PyTorch module)."""
    n = z.shape[0]
    z = z.astype(jnp.float32)
    adj = jnp.zeros((n, n), jnp.float32).at[edge_index[0], edge_index[1]].set(1.0)
    logits = z @ z.T
    numel = jnp.float32(n * n)
    pos = jnp.sum(adj)
    neg = numel - pos
    w = jnp.where(adj == 1.0, 1.0 / pos, 1.0 / neg)
    loss = (jnp.maximum(logits, 0.0) - logits * adj
            + jnp.log1p(jnp.exp(-jnp.abs(logits))))
    return jnp.sum(w * loss) / numel


if __name__ == "__main__":
    key = jax.random.PRNGKey(0)
    k_z, k_src, k_dst = jax.random.split(key, 3)

    num_nodes = 256    # N
    hidden = 32        # D (embedding dim)
    num_edges = 512    # E

    z = jax.random.normal(k_z, (num_nodes, hidden), jnp.float32)
    src = jax.random.randint(k_src, (num_edges,), 0, num_nodes, jnp.int32)
    dst = jax.random.randint(k_dst, (num_edges,), 0, num_nodes, jnp.int32)
    edge_index = jnp.stack([src, dst], axis=0)   # (2, E)

    # tile=128 so the demo exercises a real 2x2 grid: one skipped lower-triangular
    # tile, one doubled off-diagonal tile, two diagonal tiles, and the j-reduction.
    loss = jax.block_until_ready(bce_loss(z, edge_index, tile=128))
    ref = jax.block_until_ready(bce_loss_ref(z, edge_index))

    assert jnp.isfinite(loss), "loss is not finite"
    assert jnp.allclose(loss, ref, rtol=1e-5, atol=1e-6), (loss, ref)
    print("KERNEL_OK")
</pallas_src>

<mosaic_0001>
module attributes {stable_mosaic.version = 11 : i64} {
  func.func @_bce_bulk_kernel(%arg0: i32, %arg1: i32, %arg2: memref<128x32xf32, #tpu.memory_space<vmem>>, %arg3: memref<128x32xf32, #tpu.memory_space<vmem>>, %arg4: memref<8x128xf32, #tpu.memory_space<vmem>>, %arg5: memref<8x128xf32, #tpu.memory_space<vmem>>) attributes {dimension_semantics = [#tpu.dimension_semantics<parallel>, #tpu.dimension_semantics<arbitrary>], iteration_bounds = array<i64: 2, 2>, scalar_prefetch = 0 : i64, scratch_operands = 1 : i64, tpu.core_type = #tpu.core_type<tc>, window_params = [{transform_indices = @transform_0, window_bounds = array<i64: 128, 32>}, {transform_indices = @transform_1, window_bounds = array<i64: 128, 32>}, {transform_indices = @transform_2, window_bounds = array<i64: 8, 128>}]} {
    %0 = arith.cmpi sge, %arg1, %arg0 : i32
    %1 = arith.extui %0 : i1 to i32
    %c0_i32 = arith.constant 0 : i32
    %2 = arith.cmpi ne, %1, %c0_i32 : i32
    scf.if %2 {
      %3 = arith.cmpi eq, %arg1, %arg0 : i32
      %4 = arith.extui %3 : i1 to i32
      %c0_i32_0 = arith.constant 0 : i32
      %5 = arith.cmpi ne, %4, %c0_i32_0 : i32
      scf.if %5 {
        %cst_13 = arith.constant 0.000000e+00 : f32
        %58 = vector.broadcast %cst_13 : f32 to vector<8x128xf32>
        %c0_14 = arith.constant 0 : index
        %c0_15 = arith.constant 0 : index
        %59 = vector.load %arg5[%c0_14, %c0_15] : memref<8x128xf32, #tpu.memory_space<vmem>>, vector<8x128xf32>
        tpu.vector_store %arg5[%c0_14, %c0_15], %58 {strides = array<i32>} : memref<8x128xf32, #tpu.memory_space<vmem>>, vector<8x128xf32>,
      } else {
      }
      %c0 = arith.constant 0 : index
      %c0_1 = arith.constant 0 : index
      %6 = vector.load %arg2[%c0, %c0_1] : memref<128x32xf32, #tpu.memory_space<vmem>>, vector<128x32xf32>
      %c0_2 = arith.constant 0 : index
      %c0_3 = arith.constant 0 : index
      %7 = vector.load %arg3[%c0_2, %c0_3] : memref<128x32xf32, #tpu.memory_space<vmem>>, vector<128x32xf32>
      %cst = arith.constant dense<0.000000e+00> : vector<128x128xf32>
      %8 = tpu.matmul %6, %7, %cst {dimension_numbers = #tpu.dot_dimension_numbers<[1], [1], [0], [0], [0, 0, 1, 0], [], []>} : vector<128x32xf32>, vector<128x32xf32>, vector<128x128xf32> -> vector<128x128xf32>
      %cst_4 = arith.constant 0.000000e+00 : f32
      %9 = vector.broadcast %cst_4 : f32 to vector<128x128xf32>
      %10 = arith.maximumf %8, %9 : vector<128x128xf32>
      %11 = math.absf %8 : vector<128x128xf32>
      %cst_5 = arith.constant 0.000000e+00 : f32
      %12 = vector.broadcast %cst_5 : f32 to vector<128x128xf32>
      %13 = arith.subf %12, %11 : vector<128x128xf32>
      %14 = math.exp %13 : vector<128x128xf32>
      %15 = math.log1p %14 : vector<128x128xf32>
      %16 = arith.addf %10, %15 : vector<128x128xf32>
      %17 = vector.extract_strided_slice %16 {offsets = [0, 0], sizes = [8, 128], strides = [1, 1]} : vector<128x128xf32> to vector<8x128xf32>
      %18 = vector.extract_strided_slice %16 {offsets = [8, 0], sizes = [8, 128], strides = [1, 1]} : vector<128x128xf32> to vector<8x128xf32>
      %19 = vector.extract_strided_slice %16 {offsets = [16, 0], sizes = [8, 128], strides = [1, 1]} : vector<128x128xf32> to vector<8x128xf32>
      %20 = vector.extract_strided_slice %16 {offsets = [24, 0], sizes = [8, 128], strides = [1, 1]} : vector<128x128xf32> to vector<8x128xf32>
      %21 = vector.extract_strided_slice %16 {offsets = [32, 0], sizes = [8, 128], strides = [1, 1]} : vector<128x128xf32> to vector<8x128xf32>
      %22 = vector.extract_strided_slice %16 {offsets = [40, 0], sizes = [8, 128], strides = [1, 1]} : vector<128x128xf32> to vector<8x128xf32>
      %23 = vector.extract_strided_slice %16 {offsets = [48, 0], sizes = [8, 128], strides = [1, 1]} : vector<128x128xf32> to vector<8x128xf32>
      %24 = vector.extract_strided_slice %16 {offsets = [56, 0], sizes = [8, 128], strides = [1, 1]} : vector<128x128xf32> to vector<8x128xf32>
      %25 = vector.extract_strided_slice %16 {offsets = [64, 0], sizes = [8, 128], strides = [1, 1]} : vector<128x128xf32> to vector<8x128xf32>
      %26 = vector.extract_strided_slice %16 {offsets = [72, 0], sizes = [8, 128], strides = [1, 1]} : vector<128x128xf32> to vector<8x128xf32>
      %27 = vector.extract_strided_slice %16 {offsets = [80, 0], sizes = [8, 128], strides = [1, 1]} : vector<128x128xf32> to vector<8x128xf32>
      %28 = vector.extract_strided_slice %16 {offsets = [88, 0], sizes = [8, 128], strides = [1, 1]} : vector<128x128xf32> to vector<8x128xf32>
      %29 = vector.extract_strided_slice %16 {offsets = [96, 0], sizes = [8, 128], strides = [1, 1]} : vector<128x128xf32> to vector<8x128xf32>
      %30 = vector.extract_strided_slice %16 {offsets = [104, 0], sizes = [8, 128], strides = [1, 1]} : vector<128x128xf32> to vector<8x128xf32>
      %31 = vector.extract_strided_slice %16 {offsets = [112, 0], sizes = [8, 128], strides = [1, 1]} : vector<128x128xf32> to vector<8x128xf32>
      %32 = vector.extract_strided_slice %16 {offsets = [120, 0], sizes = [8, 128], strides = [1, 1]} : vector<128x128xf32> to vector<8x128xf32>
      %33 = arith.addf %17, %18 : vector<8x128xf32>
      %34 = arith.addf %19, %20 : vector<8x128xf32>
      %35 = arith.addf %21, %22 : vector<8x128xf32>
      %36 = arith.addf %23, %24 : vector<8x128xf32>
      %37 = arith.addf %25, %26 : vector<8x128xf32>
      %38 = arith.addf %27, %28 : vector<8x128xf32>
      %39 = arith.addf %29, %30 : vector<8x128xf32>
      %40 = arith.addf %31, %32 : vector<8x128xf32>
      %41 = arith.addf %33, %34 : vector<8x128xf32>
      %42 = arith.addf %35, %36 : vector<8x128xf32>
      %43 = arith.addf %37, %38 : vector<8x128xf32>
      %44 = arith.addf %39, %40 : vector<8x128xf32>
      %45 = arith.addf %41, %42 : vector<8x128xf32>
      %46 = arith.addf %43, %44 : vector<8x128xf32>
      %47 = arith.addf %45, %46 : vector<8x128xf32>
      %48 = arith.cmpi sgt, %arg1, %arg0 : i32
      %cst_6 = arith.constant 2.000000e+00 : f32
      %cst_7 = arith.constant 1.000000e+00 : f32
      %49 = arith.select %48, %cst_6, %cst_7 : f32
      %c0_8 = arith.constant 0 : index
      %c0_9 = arith.constant 0 : index
      %50 = vector.load %arg5[%c0_8, %c0_9] : memref<8x128xf32, #tpu.memory_space<vmem>>, vector<8x128xf32>
      %51 = vector.broadcast %49 : f32 to vector<8x128xf32>
      %52 = arith.mulf %51, %47 : vector<8x128xf32>
      %53 = arith.addf %50, %52 : vector<8x128xf32>
      %c0_10 = arith.constant 0 : index
      %c0_11 = arith.constant 0 : index
      %54 = vector.load %arg5[%c0_10, %c0_11] : memref<8x128xf32, #tpu.memory_space<vmem>>, vector<8x128xf32>
      tpu.vector_store %arg5[%c0_10, %c0_11], %53 {strides = array<i32>} : memref<8x128xf32, #tpu.memory_space<vmem>>, vector<8x128xf32>,
      %c1_i32 = arith.constant 1 : i32
      %55 = arith.cmpi eq, %arg1, %c1_i32 : i32
      %56 = arith.extui %55 : i1 to i32
      %c0_i32_12 = arith.constant 0 : i32
      %57 = arith.cmpi ne, %56, %c0_i32_12 : i32
      scf.if %57 {
        %c0_13 = arith.constant 0 : index
        %c0_14 = arith.constant 0 : index
        %58 = vector.load %arg5[%c0_13, %c0_14] : memref<8x128xf32, #tpu.memory_space<vmem>>, vector<8x128xf32>
        %c0_15 = arith.constant 0 : index
        %c0_16 = arith.constant 0 : index
        %59 = vector.load %arg4[%c0_15, %c0_16] : memref<8x128xf32, #tpu.memory_space<vmem>>, vector<8x128xf32>
        tpu.vector_store %arg4[%c0_15, %c0_16], %58 {strides = array<i32>} : memref<8x128xf32, #tpu.memory_space<vmem>>, vector<8x128xf32>,
      } else {
      }
    } else {
    }
    return
  }
  func.func @transform_0(%arg0: i32, %arg1: i32) -> (i32, i32) {
    %c0_i32 = arith.constant 0 : i32
    %c0_i32_0 = arith.constant 0 : i32
    return %arg0, %c0_i32 : i32, i32
  }
  func.func @transform_1(%arg0: i32, %arg1: i32) -> (i32, i32) {
    %c0_i32 = arith.constant 0 : i32
    %c0_i32_0 = arith.constant 0 : i32
    return %arg1, %c0_i32 : i32, i32
  }
  func.func @transform_2(%arg0: i32, %arg1: i32) -> (i32, i32) {
    %c0_i32 = arith.constant 0 : i32
    %c0_i32_0 = arith.constant 0 : i32
    return %arg0, %c0_i32 : i32, i32
  }
}

</mosaic_0001>

<bundles_post_ra>
// kernel: tpu_custom_call.1
= control target key start
LH: loop header
LB: loop body
LE: loop exit
PB: predicated region body
PF: predicated region fallthrough
CT: control target
= control target key end

     0   :  { %7 = vsyncpa [#allocation4], 0  ;;  %s1603_s0 = inlined_call_operand.vmem [shape: f32[256,32], index: 0, kind: input, shape index: {}]   ;;  %s1604_s1 = inlined_call_operand.vmem [shape: f32[256,32], index: 1, kind: input, shape index: {}]   ;;  %s1605_s2 = inlined_call_operand.hbm [shape: f32[16,128], index: 2, kind: output, shape index: {}]  }
   0x1   :  { %9 = vsyncpa [#allocation4 + $0x1], 0  ;;  %s1092_s9 = smov 0   ;;  %s1094_s10 = smov 0  }
   0x2   :  { %s1096_s11 = smov 0   ;;  %s1098_s12 = smov 0  }
   0x3   :  { %s1100_s13 = smov 0   ;;  %s1102_s14 = smov 0  }
   0x4   :  { %s1104_s15 = smov 0   ;;  %s1106_s16 = smov 0  }
   0x5 LB: > { %s747_s17 = sadd.s32 4294967295, %s1074_s16   ;;  %s748_s18 = sadd.s32 4294967294, %s1074_s16   ;;  %s1074_s16 = sphi %s1106_s16, %s15_s16   ;;  %s1070_s15 = sphi %s1104_s15, %s1640_s15   ;;  %s1066_s14 = sphi %s1102_s14, %s1639_s14   ;;  %s1062_s13 = sphi %s1100_s13, %s1638_s13   ;;  %s1058_s12 = sphi %s1098_s12, %s1637_s12   ;;  %s1054_s11 = sphi %s1096_s11, %s1636_s11   ;;  %s1050_s10 = sphi %s1094_s10, %s1635_s10   ;;  %s1046_s9 = sphi %s1092_s9, %s1634_s9  }
   0x6   : > { %s24_s19 = sadd.s32 1, %s1066_s14  ;;  %s27_s20 = sadd.s32 1, %s1070_s15 }
   0x7   : > { %p25_p0 = scmp.ge.s32.totalorder %s24_s19, 2  ;;  %p96_p1 = scmp.ne.s32.totalorder %s1054_s11, %s1050_s10 }
   0x8   : > { %p97_p2 = scmp.eq.s32.totalorder %s747_s17, 3  ;;  %p102_p4 = scmp.ne.s32.totalorder %s1050_s10, %s1046_s9 }
   0x9   : > { %s1642_s19 = smov (%p25_p0, %s24_s19), 0  ;;  %s1644_s20 = smov (!%p25_p0, %s27_s20), %s1070_s15 }
   0xa   : > { %p1141_p3 = por %p97_p2, %p96_p1  ;;  %p29_p5 = scmp.ge.s32.totalorder %s1644_s20, 2 }
   0xb   : > { %p103_p6 = scmp.eq.s32.totalorder %s748_s18, 3  ;;  %p751_p7 = scmp.ge.s32.totalorder %s1074_s16, 1 }
   0xc   : > { %p139_p8 = scmp.lt.s32.totalorder %s1074_s16, 5  ;;  %s1646_s20 = smov (%p29_p5, %s1644_s20), 0 }
   0xd   : > { %p1151_p9 = por %p103_p6, %p102_p4  ;;  %s83_s23 = ssub.s32 %s1070_s15, %s1646_s20 }
   0xe   : > { %p140_p10 = pnand %p751_p7, %p139_p8  ;;  %s86_s24 = sadd.s32 1, %s1054_s11 }
   0xf   : > { %p84_p11 = scmp.eq.s32.totalorder %s83_s23, 0  ;;  %s163_s26 = sand.u32 (!%p140_p10), 1, %s1050_s10  }
  0x10   : > { %143 = sbr.rel (%p140_p10) target bundleno = 331 (0x14b), region = 28  ;;  %s753_s27 = sshll.u32 (!%p140_p10), %s1062_s13, 4 }
  0x11   : > { %s1159_s25 = scalar_select %p84_p11, %s1054_s11, %s86_s24  }
  0x12   : > { %s1165_s28 = sshll.u32 (!%p140_p10), %s163_s26, 3  ;;  %p167_p12 = scmp.lt.s32.totalorder (!%p140_p10), %s753_s27, 31 }
  0x13   : > { %s755_s29 = sshll.u32 (!%p140_p10), %s1058_s12, 4  ;;  %s165_s18 = scalar_lea.vmem (!%p140_p10), [#allocation3], %s1165_s28 }
  0x14   : > { %p173_p13 = scmp.lt.s32.totalorder (!%p140_p10), %s755_s29, 31  ;;  %p757_p0 = scmp.lt.s32.totalorder (!%p140_p10), %s1058_s12, %s1062_s13 }
  0x15   : > { %s1648_s27 = smov (!%p167_p12, %s753_s27), 31  ;;  %p758_p1 = scmp.ne.s32.totalorder (!%p757_p0), %s1058_s12, %s1062_s13 }
  0x16   : > { %s754_s30 = sshll.u32 %s1648_s27, 3  ;;  %s1650_s29 = smov (!%p173_p13, %s755_s29), 31 }
  0x17   : > { %s1171_s5 = scalar_lea.vmem %s1603_s0, %s754_s30  ;;  %s756_s6 = sshll.u32 %s1650_s29, 3 }
  0x18   : > { %s1176_s17 = scalar_lea.vmem %s1604_s1, %s756_s6  ;;  %181 = sbr.rel (%p757_p0) target bundleno = 316 (0x13c), region = 32 }
  0x1d   : > { %185 = sbr.rel (%p758_p1) target bundleno = 36 (0x24), region = 36 }
  0x22   : > { %v1076_v0 = vmov 0.0  }
  0x23   : > { %186 = vst [vmem:[#allocation2] sm:$0xff] %v1076_v0 }
  0x24 PF: > { %v218_v1 = vld [vmem:[%s1176_s17 + $0x78] sm:$0xff]  ;;  %vm219_vm0 = vcmask 261120   ;;  %v217_v2 = vld [vmem:[%s1176_s17 + $0x70] sm:$0xff]  ;;  %v216_v3 = vld [vmem:[%s1176_s17 + $0x68] sm:$0xff]  ;;  %p636_p2 = scmp.gt.s32.totalorder %s1058_s12, %s1062_s13  ;;  %p791_p4 = scmp.ne.s32.totalorder %s1058_s12, 1 }
  0x25   : > { %759 = vmatpush.xpose.msk.msra.mxu0 %vm219_vm0, %v218_v1  ;;  %796 = vmatpush.xpose.msk.msra.mxu1 %vm219_vm0, %v218_v1  ;;  %v215_v4 = vld [vmem:[%s1176_s17 + $0x60] sm:$0xff]  ;;  %v214_v5 = vld [vmem:[%s1176_s17 + $0x58] sm:$0xff]  ;;  %v213_v6 = vld [vmem:[%s1176_s17 + $0x50] sm:$0xff] }
  0x26   : > { %797 = vmatpush.xpose.msk.msra.mxu2 %vm219_vm0, %v218_v1  ;;  %798 = vmatpush.xpose.msk.msra.mxu3 %vm219_vm0, %v218_v1  ;;  %v212_v7 = vld [vmem:[%s1176_s17 + $0x48] sm:$0xff]  ;;  %v211_v8 = vld [vmem:[%s1176_s17 + $0x40] sm:$0xff]  ;;  %v210_v9 = vld [vmem:[%s1176_s17 + $0x38] sm:$0xff]  ;;  %s637_s23 = scalar_select %p636_p2, 2.0, 1.0 }
  0x27   : > { %v209_v10 = vld [vmem:[%s1176_s17 + $0x30] sm:$0xff]  ;;  %v208_v11 = vld [vmem:[%s1176_s17 + $0x28] sm:$0xff]  ;;  %v207_v12 = vld [vmem:[%s1176_s17 + $0x20] sm:$0xff] }
  0x28   : > { %v206_v13 = vld [vmem:[%s1176_s17 + $0x18] sm:$0xff]  ;;  %v205_v14 = vld [vmem:[%s1176_s17 + $0x10] sm:$0xff]  ;;  %v204_v15 = vld [vmem:[%s1176_s17 + $0x8] sm:$0xff] }
  0x29   : > { %760 = vmatpush.xpose.msk.msra.mxu0 %vm219_vm0, %v217_v2  ;;  %799 = vmatpush.xpose.msk.msra.mxu1 %vm219_vm0, %v217_v2  ;;  %v203_v16 = vld [vmem:[%s1176_s17] sm:$0xff]  ;;  %v188_v21 = vld [vmem:[%s1171_s5 + $0x8] sm:$0xff]  ;;  %v189_v25 = vld [vmem:[%s1171_s5 + $0x10] sm:$0xff] }
  0x2a   : > { %800 = vmatpush.xpose.msk.msra.mxu2 %vm219_vm0, %v217_v2  ;;  %801 = vmatpush.xpose.msk.msra.mxu3 %vm219_vm0, %v217_v2  ;;  %v187_v17 = vld [vmem:[%s1171_s5] sm:$0xff]  ;;  %v192_v22 = vld [vmem:[%s1171_s5 + $0x28] sm:$0xff]  ;;  %v193_v26 = vld [vmem:[%s1171_s5 + $0x30] sm:$0xff] }
  0x2b   : > { %v191_v18 = vld [vmem:[%s1171_s5 + $0x20] sm:$0xff]  ;;  %v196_v23 = vld [vmem:[%s1171_s5 + $0x48] sm:$0xff]  ;;  %v197_v27 = vld [vmem:[%s1171_s5 + $0x50] sm:$0xff] }
  0x2c   : > { %v195_v19 = vld [vmem:[%s1171_s5 + $0x40] sm:$0xff]  ;;  %v200_v24 = vld [vmem:[%s1171_s5 + $0x68] sm:$0xff]  ;;  %v201_v28 = vld [vmem:[%s1171_s5 + $0x70] sm:$0xff] }
  0x2d   : > { %761 = vmatpush.xpose.msk.msra.mxu0 %vm219_vm0, %v216_v3  ;;  %802 = vmatpush.xpose.msk.msra.mxu1 %vm219_vm0, %v216_v3  ;;  %v199_v20 = vld [vmem:[%s1171_s5 + $0x60] sm:$0xff]  ;;  %v190_v29 = vld [vmem:[%s1171_s5 + $0x18] sm:$0xff] }
  0x2e   : > { %803 = vmatpush.xpose.msk.msra.mxu2 %vm219_vm0, %v216_v3  ;;  %804 = vmatpush.xpose.msk.msra.mxu3 %vm219_vm0, %v216_v3  ;;  %v194_v30 = vld [vmem:[%s1171_s5 + $0x38] sm:$0xff] }
  0x2f   : > { %v198_v31 = vld [vmem:[%s1171_s5 + $0x58] sm:$0xff] }
  0x30   : > { %v202_v32 = vld [vmem:[%s1171_s5 + $0x78] sm:$0xff] }
  0x31   : > { %762 = vmatpush.xpose.msk.msra.mxu0 %vm219_vm0, %v215_v4  ;;  %805 = vmatpush.xpose.msk.msra.mxu1 %vm219_vm0, %v215_v4 }
  0x32   : > { %806 = vmatpush.xpose.msk.msra.mxu2 %vm219_vm0, %v215_v4  ;;  %807 = vmatpush.xpose.msk.msra.mxu3 %vm219_vm0, %v215_v4 }
  0x35   : > { %763 = vmatpush.xpose.msk.msra.mxu0 %vm219_vm0, %v214_v5  ;;  %808 = vmatpush.xpose.msk.msra.mxu1 %vm219_vm0, %v214_v5 }
  0x36   : > { %809 = vmatpush.xpose.msk.msra.mxu2 %vm219_vm0, %v214_v5  ;;  %810 = vmatpush.xpose.msk.msra.mxu3 %vm219_vm0, %v214_v5 }
  0x39   : > { %764 = vmatpush.xpose.msk.msra.mxu0 %vm219_vm0, %v213_v6  ;;  %811 = vmatpush.xpose.msk.msra.mxu1 %vm219_vm0, %v213_v6 }
  0x3a   : > { %812 = vmatpush.xpose.msk.msra.mxu2 %vm219_vm0, %v213_v6  ;;  %813 = vmatpush.xpose.msk.msra.mxu3 %vm219_vm0, %v213_v6 }
  0x3d   : > { %765 = vmatpush.xpose.msk.msra.mxu0 %vm219_vm0, %v212_v7  ;;  %814 = vmatpush.xpose.msk.msra.mxu1 %vm219_vm0, %v212_v7 }
  0x3e   : > { %815 = vmatpush.xpose.msk.msra.mxu2 %vm219_vm0, %v212_v7  ;;  %816 = vmatpush.xpose.msk.msra.mxu3 %vm219_vm0, %v212_v7 }
  0x41   : > { %766 = vmatpush.xpose.msk.msra.mxu0 %vm219_vm0, %v211_v8  ;;  %817 = vmatpush.xpose.msk.msra.mxu1 %vm219_vm0, %v211_v8 }
  0x42   : > { %818 = vmatpush.xpose.msk.msra.mxu2 %vm219_vm0, %v211_v8  ;;  %819 = vmatpush.xpose.msk.msra.mxu3 %vm219_vm0, %v211_v8 }
  0x45   : > { %767 = vmatpush.xpose.msk.msra.mxu0 %vm219_vm0, %v210_v9  ;;  %820 = vmatpush.xpose.msk.msra.mxu1 %vm219_vm0, %v210_v9 }
  0x46   : > { %821 = vmatpush.xpose.msk.msra.mxu2 %vm219_vm0, %v210_v9  ;;  %822 = vmatpush.xpose.msk.msra.mxu3 %vm219_vm0, %v210_v9 }
  0x49   : > { %768 = vmatpush.xpose.msk.msra.mxu0 %vm219_vm0, %v209_v10  ;;  %823 = vmatpush.xpose.msk.msra.mxu1 %vm219_vm0, %v209_v10 }
  0x4a   : > { %824 = vmatpush.xpose.msk.msra.mxu2 %vm219_vm0, %v209_v10  ;;  %825 = vmatpush.xpose.msk.msra.mxu3 %vm219_vm0, %v209_v10 }
  0x4d   : > { %769 = vmatpush.xpose.msk.msra.mxu0 %vm219_vm0, %v208_v11  ;;  %826 = vmatpush.xpose.msk.msra.mxu1 %vm219_vm0, %v208_v11 }
  0x4e   : > { %827 = vmatpush.xpose.msk.msra.mxu2 %vm219_vm0, %v208_v11  ;;  %828 = vmatpush.xpose.msk.msra.mxu3 %vm219_vm0, %v208_v11 }
  0x51   : > { %770 = vmatpush.xpose.msk.msra.mxu0 %vm219_vm0, %v207_v12  ;;  %829 = vmatpush.xpose.msk.msra.mxu1 %vm219_vm0, %v207_v12 }
  0x52   : > { %830 = vmatpush.xpose.msk.msra.mxu2 %vm219_vm0, %v207_v12  ;;  %831 = vmatpush.xpose.msk.msra.mxu3 %vm219_vm0, %v207_v12 }
  0x55   : > { %771 = vmatpush.xpose.msk.msra.mxu0 %vm219_vm0, %v206_v13  ;;  %832 = vmatpush.xpose.msk.msra.mxu1 %vm219_vm0, %v206_v13 }
  0x56   : > { %833 = vmatpush.xpose.msk.msra.mxu2 %vm219_vm0, %v206_v13  ;;  %834 = vmatpush.xpose.msk.msra.mxu3 %vm219_vm0, %v206_v13 }
  0x59   : > { %772 = vmatpush.xpose.msk.msra.mxu0 %vm219_vm0, %v205_v14  ;;  %835 = vmatpush.xpose.msk.msra.mxu1 %vm219_vm0, %v205_v14 }
  0x5a   : > { %836 = vmatpush.xpose.msk.msra.mxu2 %vm219_vm0, %v205_v14  ;;  %837 = vmatpush.xpose.msk.msra.mxu3 %vm219_vm0, %v205_v14 }
  0x5d   : > { %773 = vmatpush.xpose.msk.msra.mxu0 %vm219_vm0, %v204_v15  ;;  %838 = vmatpush.xpose.msk.msra.mxu1 %vm219_vm0, %v204_v15 }
  0x5e   : > { %839 = vmatpush.xpose.msk.msra.mxu2 %vm219_vm0, %v204_v15  ;;  %840 = vmatpush.xpose.msk.msra.mxu3 %vm219_vm0, %v204_v15 }
  0x61   : > { %774 = vmatpush.xpose.msk.msra.mxu0 %vm219_vm0, %v203_v16  ;;  %841 = vmatpush.xpose.msk.msra.mxu1 %vm219_vm0, %v203_v16 }
  0x62   : > { %842 = vmatpush.xpose.msk.msra.mxu2 %vm219_vm0, %v203_v16  ;;  %843 = vmatpush.xpose.msk.msra.mxu3 %vm219_vm0, %v203_v16 }
  0x64   : > { %775 = vmatmul.msk.f32.vlgmr.msra.gmra.mxu0 %vm219_vm0, %v187_v17  ;;  %779 = vmatmul.msk.f32.vlgmr.msra.gmra.mxu1 %vm219_vm0, %v191_v18 }
  0x65   : > { %783 = vmatmul.msk.f32.vlgmr.msra.gmra.mxu2 %vm219_vm0, %v195_v19  ;;  %787 = vmatmul.msk.f32.vlgmr.msra.gmra.mxu3 %vm219_vm0, %v199_v20 }
  0x6c   : > { %776 = vmatmul.msk.f32.gmra.mxu0 %vm219_vm0, %v188_v21  ;;  %780 = vmatmul.msk.f32.gmra.mxu1 %vm219_vm0, %v192_v22 }
  0x6d   : > { %784 = vmatmul.msk.f32.gmra.mxu2 %vm219_vm0, %v196_v23  ;;  %788 = vmatmul.msk.f32.gmra.mxu3 %vm219_vm0, %v200_v24 }
  0x74   : > { %777 = vmatmul.msk.f32.gmra.mxu0 %vm219_vm0, %v189_v25  ;;  %781 = vmatmul.msk.f32.gmra.mxu1 %vm219_vm0, %v193_v26 }
  0x75   : > { %785 = vmatmul.msk.f32.gmra.mxu2 %vm219_vm0, %v197_v27  ;;  %789 = vmatmul.msk.f32.gmra.mxu3 %vm219_vm0, %v201_v28 }
  0x7c   : > { %778 = vmatmul.msk.f32.gmra.mxu0 %vm219_vm0, %v190_v29  ;;  %782 = vmatmul.msk.f32.gmra.mxu1 %vm219_vm0, %v194_v30 }
  0x7d   : > { %786 = vmatmul.msk.f32.gmra.mxu2 %vm219_vm0, %v198_v31  ;;  %790 = vmatmul.msk.f32.gmra.mxu3 %vm219_vm0, %v202_v32 }
  0xe1   : > { %v1295_v33 = vpop.f32.mrf.mxu0  ;;  %v1297_v34 = vpop.f32.mrf.mxu1 }
  0xe2   : > { %v397_v35 = vand.u32 2147483647, %v1295_v33  ;;  %v401_v36 = vand.u32 2147483647, %v1297_v34  ;;  %v381_v8 = vmax.f32 %v1295_v33, 0.0  ;;  %v385_v9 = vmax.f32 %v1297_v34, 0.0 }
  0xe4   : > { %v413_v37 = vsub.f32 0.0, %v397_v35  ;;  %v417_v38 = vsub.f32 0.0, %v401_v36 }
  0xe6   : > { %v429_v39 = vmul.f32 1.442695, %v413_v37  ;;  %v437_v44 = vmul.f32 1.442695, %v417_v38 }
  0xe8   : > { %v1301_v40 = vpop.f32.mrf.mxu2  ;;  %v1303_v41 = vpop.f32.mrf.mxu3  ;;  %916 = vpow2.f32 %v429_v39 }
  0xe9   : > { %v405_v42 = vand.u32 2147483647, %v1301_v40  ;;  %v1306_v43 = vpop.f32.mrf.mxu0  ;;  %v409_v45 = vand.u32 2147483647, %v1303_v41  ;;  %v1310_v48 = vpop.f32.mrf.mxu1  ;;  %918 = vpow2.f32 %v437_v44  ;;  %v389_v14 = vmax.f32 %v1301_v40, 0.0 }
  0xea   : > { %v398_v46 = vand.u32 2147483647, %v1306_v43  ;;  %v402_v51 = vand.u32 2147483647, %v1310_v48  ;;  %v393_v15 = vmax.f32 %v1303_v41, 0.0  ;;  %v382_v20 = vmax.f32 %v1306_v43, 0.0 }
  0xeb   : > { %v421_v47 = vsub.f32 0.0, %v405_v42  ;;  %v425_v49 = vsub.f32 0.0, %v409_v45  ;;  %v386_v21 = vmax.f32 %v1310_v48, 0.0 }
  0xec   : > { %v414_v50 = vsub.f32 0.0, %v398_v46  ;;  %v418_v56 = vsub.f32 0.0, %v402_v51 }
  0xed   : > { %v445_v52 = vmul.f32 1.442695, %v421_v47  ;;  %v453_v53 = vmul.f32 1.442695, %v425_v49 }
  0xee   : > { %v917_v54 = vpop.eup %916  ;;  %v431_v55 = vmul.f32 1.442695, %v414_v50  ;;  %v439_v60 = vmul.f32 1.442695, %v418_v56 }
  0xef   : > { %920 = vpow2.f32 %v445_v52  ;;  %v919_v57 = vpop.eup %918  ;;  %v461_v58 = vadd.f32 1.0, %v917_v54  ;;  %v464_v1 = vmul.f32 -0.5, %v917_v54  ;;  %v467_v3 = vand.u32 2147483647, %v917_v54 }
  0xf0   : > { %922 = vpow2.f32 %v453_v53  ;;  %v1313_v59 = vpop.f32.mrf.mxu2  ;;  %v1315_v61 = vpop.f32.mrf.mxu3  ;;  %v497_v62 = vadd.f32 1.0, %v919_v57  ;;  %v500_v5 = vmul.f32 -0.5, %v919_v57  ;;  %v503_v6 = vand.u32 2147483647, %v919_v57 }
  0xf1   : > { %924 = vpow2.f32 %v431_v55  ;;  %v406_v63 = vand.u32 2147483647, %v1313_v59  ;;  %v410_v2 = vand.u32 2147483647, %v1315_v61  ;;  %v1328_v12 = vpop.f32.mrf.mxu0  ;;  %v465_v13 = vadd.f32 1.0, %v464_v1  ;;  %v1332_v17 = vpop.f32.mrf.mxu1 }
  0xf2   : > { %926 = vlog2.f32 %v461_v58  ;;  %vm1334_vm1 = vcmp.lt.f32.partialorder %v467_v3, 0.0004427343  ;;  %v501_v23 = vadd.f32 1.0, %v500_v5  ;;  %vm1341_vm2 = vcmp.lt.f32.partialorder %v503_v6, 0.0004427343 }
  0xf3   : > { %928 = vpow2.f32 %v439_v60  ;;  %v422_v11 = vsub.f32 0.0, %v406_v63  ;;  %v426_v16 = vsub.f32 0.0, %v410_v2  ;;  %v399_v26 = vand.u32 2147483647, %v1328_v12 }
  0xf4   : > { %930 = vlog2.f32 %v497_v62  ;;  %v390_v29 = vmax.f32 %v1313_v59, 0.0  ;;  %v403_v31 = vand.u32 2147483647, %v1332_v17  ;;  %v466_v35 = vmul.f32 %v917_v54, %v465_v13 }
  0xf5   : > { %v1318_v0 = vpop.eup %920  ;;  %v447_v30 = vmul.f32 1.442695, %v422_v11  ;;  %v394_v37 = vmax.f32 %v1315_v61, 0.0  ;;  %v455_v38 = vmul.f32 1.442695, %v426_v16  ;;  %v502_v45 = vmul.f32 %v919_v57, %v501_v23 }
  0xf6   : > { %v1321_v4 = vpop.eup %922  ;;  %v533_v10 = vadd.f32 1.0, %v1318_v0  ;;  %v536_v36 = vmul.f32 -0.5, %v1318_v0  ;;  %v415_v47 = vsub.f32 0.0, %v399_v26  ;;  %v383_v50 = vmax.f32 %v1328_v12, 0.0 }
  0xf7   : > { %v1323_v7 = vpop.eup %924  ;;  %v569_v19 = vadd.f32 1.0, %v1321_v4  ;;  %v572_v42 = vmul.f32 -0.5, %v1321_v4  ;;  %v419_v51 = vsub.f32 0.0, %v403_v31  ;;  %v539_v52 = vand.u32 2147483647, %v1318_v0 }
  0xf8   : > { %v927_v22 = vpop.eup %926  ;;  %v470_v25 = vadd.f32 1.0, %v1323_v7  ;;  %v1347_v27 = vpop.f32.mrf.mxu2  ;;  %932 = vlog2.f32 %v533_v10  ;;  %v575_v53 = vand.u32 2147483647, %v1321_v4  ;;  %v387_v54 = vmax.f32 %v1332_v17, 0.0 }
  0xf9   : > { %v1349_v28 = vpop.eup %928  ;;  %v463_v39 = vmul.f32 0.6931472, %v927_v22  ;;  %934 = vlog2.f32 %v569_v19  ;;  %v407_v44 = vand.u32 2147483647, %v1347_v27  ;;  %v1362_v55 = vpop.f32.mrf.mxu3  ;;  %v537_v58 = vadd.f32 1.0, %v536_v36 }
  0xfa   : > { %v931_v32 = vpop.eup %930  ;;  %936 = vlog2.f32 %v470_v25  ;;  %v506_v46 = vadd.f32 1.0, %v1349_v28  ;;  %v573_v60 = vadd.f32 1.0, %v572_v42  ;;  %v473_v63 = vmul.f32 -0.5, %v1323_v7  ;;  %v1397_v36 = vpop.f32.mrf.mxu0 }
  0xfb   : > { %v499_v49 = vmul.f32 0.6931472, %v931_v32  ;;  %938 = vpow2.f32 %v447_v30  ;;  %v469_v57 = vsel %vm1334_vm1, %v466_v35, %v463_v39  ;;  %v423_v62 = vsub.f32 0.0, %v407_v44  ;;  %v1399_v33 = vpop.f32.mrf.mxu1 }
  0xfc   : > { %940 = vpow2.f32 %v455_v38  ;;  %v476_v1 = vand.u32 2147483647, %v1323_v7  ;;  %v433_v2 = vmul.f32 1.442695, %v415_v47  ;;  %v509_v6 = vmul.f32 -0.5, %v1349_v28 }
  0xfd   : > { %942 = vlog2.f32 %v506_v46  ;;  %v505_v5 = vsel %vm1341_vm2, %v502_v45, %v499_v49  ;;  %v441_v10 = vmul.f32 1.442695, %v419_v51  ;;  %v411_v11 = vand.u32 2147483647, %v1362_v55 }
  0xfe   : > { %v933_v56 = vpop.eup %932  ;;  %vm1372_vm3 = vcmp.lt.f32.partialorder %v539_v52, 0.0004427343  ;;  %vm1376_vm4 = vcmp.lt.f32.partialorder %v575_v53, 0.0004427343  ;;  %v1384_v23 = vadd.f32 %v469_v57, %v381_v8  ;;  %v538_v24 = vmul.f32 %v1318_v0, %v537_v58 }
  0xff   : > { %v935_v3 = vpop.eup %934  ;;  %v535_v16 = vmul.f32 0.6931472, %v933_v56  ;;  %v1388_v25 = vmul.f32 %v1321_v4, %v573_v60  ;;  %v449_v26 = vmul.f32 1.442695, %v423_v62  ;;  %v1394_v31 = vadd.f32 %v505_v5, %v385_v9 }
 0x100   : > { %v937_v13 = vpop.eup %936  ;;  %v474_v32 = vadd.f32 1.0, %v473_v63  ;;  %v512_v35 = vand.u32 2147483647, %v1349_v28  ;;  %944 = vpow2.f32 %v433_v2  ;;  %vm1401_vm5 = vcmp.lt.f32.partialorder %v476_v1, 0.0004427343  ;;  %v1431_v1 = vpop.f32.mrf.mxu2 }
 0x101   : > { %v1380_v22 = vpop.eup %938  ;;  %v510_v4 = vadd.f32 1.0, %v509_v6  ;;  %946 = vpow2.f32 %v441_v10  ;;  %v427_v8 = vsub.f32 0.0, %v411_v11  ;;  %v541_v34 = vsel %vm1372_vm3, %v538_v24, %v535_v16  ;;  %v1446_v24 = vpop.f32.mrf.mxu3 }
 0x102   : > { %v1390_v30 = vpop.eup %940  ;;  %v1407_v9 = vmul.f32 0.6931472, %v935_v3  ;;  %v472_v39 = vmul.f32 0.6931472, %v937_v13  ;;  %v542_v42 = vadd.f32 1.0, %v1380_v22  ;;  %948 = vpow2.f32 %v449_v26 }
 0x103   : > { %v943_v38 = vpop.eup %942  ;;  %v578_v44 = vadd.f32 1.0, %v1390_v30  ;;  %v400_v45 = vand.u32 2147483647, %v1397_v36  ;;  %v404_v46 = vand.u32 2147483647, %v1399_v33  ;;  %v475_v47 = vmul.f32 %v1323_v7, %v474_v32 }
 0x104   : > { %vm1414_vm6 = vcmp.lt.f32.partialorder %v512_v35, 0.0004427343  ;;  %v545_v51 = vmul.f32 -0.5, %v1380_v22  ;;  %v457_v52 = vmul.f32 1.442695, %v427_v8  ;;  %v1421_v53 = vadd.f32 %v541_v34, %v389_v14 }
 0x105   : > { %v508_v56 = vmul.f32 0.6931472, %v943_v38  ;;  %v511_v57 = vmul.f32 %v1349_v28, %v510_v4  ;;  %v391_v58 = vmax.f32 %v1347_v27, 0.0  ;;  %v577_v7 = vsel %vm1376_vm4, %v1388_v25, %v1407_v9 }
 0x106   : > { %v1425_v60 = vpop.eup %944  ;;  %950 = vlog2.f32 %v542_v42  ;;  %v416_v62 = vsub.f32 0.0, %v400_v45  ;;  %v420_v63 = vsub.f32 0.0, %v404_v46  ;;  %v478_v14 = vsel %vm1401_vm5, %v475_v47, %v472_v39 }
 0x107   : > { %v1433_v40 = vpop.eup %946  ;;  %v548_v28 = vand.u32 2147483647, %v1380_v22  ;;  %952 = vlog2.f32 %v578_v44  ;;  %v395_v2 = vmax.f32 %v1362_v55, 0.0  ;;  %v546_v3 = vadd.f32 1.0, %v545_v51 }
 0x108   : > { %954 = vpow2.f32 %v457_v52  ;;  %v384_v5 = vmax.f32 %v1397_v36, 0.0  ;;  %v435_v6 = vmul.f32 1.442695, %v416_v62  ;;  %v1440_v10 = vpop.eup %948  ;;  %v514_v11 = vsel %vm1414_vm6, %v511_v57, %v508_v56 }
 0x109   : > { %v479_v13 = vadd.f32 1.0, %v1425_v60  ;;  %v443_v16 = vmul.f32 1.442695, %v420_v63  ;;  %v408_v18 = vand.u32 2147483647, %v1431_v1  ;;  %v581_v26 = vmul.f32 -0.5, %v1390_v30 }
 0x10a   : > { %v584_v32 = vand.u32 2147483647, %v1390_v30  ;;  %v515_v35 = vadd.f32 1.0, %v1433_v40  ;;  %956 = vpow2.f32 %v435_v6  ;;  %v1453_v0 = vadd.f32 %v478_v14, %v382_v20 }
 0x10b   : > { %vm1455_vm7 = vcmp.lt.f32.partialorder %v548_v28, 0.0004427343  ;;  %958 = vpow2.f32 %v443_v16  ;;  %v424_v8 = vsub.f32 0.0, %v408_v18  ;;  %v482_v34 = vmul.f32 -0.5, %v1425_v60 }
 0x10c   : > { %v951_v38 = vpop.eup %950  ;;  %v518_v39 = vmul.f32 -0.5, %v1433_v40  ;;  %v551_v42 = vadd.f32 1.0, %v1440_v10  ;;  %v412_v44 = vand.u32 2147483647, %v1446_v24  ;;  %v1465_v43 = vadd.f32 %v514_v11, %v386_v21 }
 0x10d   : > { %v953_v45 = vpop.eup %952  ;;  %v547_v20 = vmul.f32 %v1380_v22, %v546_v3  ;;  %960 = vlog2.f32 %v479_v13  ;;  %v451_v46 = vmul.f32 1.442695, %v424_v8  ;;  %v582_v49 = vadd.f32 1.0, %v581_v26 }
 0x10e   : > { %v1468_v47 = vpop.eup %954  ;;  %vm1470_vm8 = vcmp.lt.f32.partialorder %v584_v32, 0.0004427343  ;;  %962 = vlog2.f32 %v515_v35  ;;  %v428_v52 = vsub.f32 0.0, %v412_v44  ;;  %v544_v56 = vmul.f32 0.6931472, %v951_v38 }
 0x10f   : > { %v485_v57 = vand.u32 2147483647, %v1425_v60  ;;  %v521_v48 = vand.u32 2147483647, %v1433_v40  ;;  %964 = vpow2.f32 %v451_v46  ;;  %v483_v62 = vadd.f32 1.0, %v482_v34 }
 0x110   : > { %v957_v21 = vpop.eup %956  ;;  %v519_v22 = vadd.f32 1.0, %v518_v39  ;;  %966 = vlog2.f32 %v551_v42  ;;  %v459_v63 = vmul.f32 1.442695, %v428_v52  ;;  %v580_v28 = vmul.f32 0.6931472, %v953_v45 }
 0x111   : > { %v959_v14 = vpop.eup %958  ;;  %v554_v3 = vmul.f32 -0.5, %v1440_v10  ;;  %v587_v6 = vadd.f32 1.0, %v1468_v47  ;;  %v488_v11 = vadd.f32 1.0, %v957_v21  ;;  %v583_v13 = vmul.f32 %v1390_v30, %v582_v49 }
 0x112   : > { %v491_v16 = vmul.f32 -0.5, %v957_v21  ;;  %v524_v18 = vadd.f32 1.0, %v959_v14  ;;  %968 = vpow2.f32 %v459_v63  ;;  %v550_v32 = vsel %vm1455_vm7, %v547_v20, %v544_v56 }
 0x113   : > { %v961_v26 = vpop.eup %960  ;;  %v557_v35 = vand.u32 2147483647, %v1440_v10  ;;  %970 = vlog2.f32 %v488_v11  ;;  %v527_v8 = vmul.f32 -0.5, %v959_v14  ;;  %v484_v34 = vmul.f32 %v1425_v60, %v483_v62 }
 0x114   : > { %v963_v38 = vpop.eup %962  ;;  %vm1483_vm9 = vcmp.lt.f32.partialorder %v485_v57, 0.0004427343  ;;  %vm1487_vm10 = vcmp.lt.f32.partialorder %v521_v48, 0.0004427343  ;;  %v388_v42 = vmax.f32 %v1399_v33, 0.0  ;;  %972 = vlog2.f32 %v524_v18 }
 0x115   : > { %v965_v4 = vpop.eup %964  ;;  %v586_v44 = vsel %vm1470_vm8, %v583_v13, %v580_v28  ;;  %v520_v45 = vmul.f32 %v1433_v40, %v519_v22  ;;  %v555_v20 = vadd.f32 1.0, %v554_v3  ;;  %974 = vlog2.f32 %v587_v6 }
 0x116   : > { %v967_v60 = vpop.eup %966  ;;  %v1497_v46 = vadd.f32 %v550_v32, %v390_v29  ;;  %v492_v49 = vadd.f32 1.0, %v491_v16  ;;  %v494_v52 = vand.u32 2147483647, %v957_v21  ;;  %v560_v56 = vadd.f32 1.0, %v965_v4 }
 0x117   : > { %v481_v57 = vmul.f32 0.6931472, %v961_v26  ;;  %vm1499_vm11 = vcmp.lt.f32.partialorder %v557_v35, 0.0004427343  ;;  %v528_v48 = vadd.f32 1.0, %v527_v8  ;;  %v563_v51 = vmul.f32 -0.5, %v965_v4 }
 0x118   : > { %v969_v62 = vpop.eup %968  ;;  %v618_v40 = vadd.f32 %v586_v44, %v394_v37  ;;  %v590_v22 = vmul.f32 -0.5, %v1468_v47  ;;  %v530_v63 = vand.u32 2147483647, %v959_v14  ;;  %976 = vlog2.f32 %v560_v56 }
 0x119   : > { %v971_v59 = vpop.eup %970  ;;  %v517_v29 = vmul.f32 0.6931472, %v963_v38  ;;  %v553_v28 = vmul.f32 0.6931472, %v967_v60  ;;  %v556_v3 = vmul.f32 %v1440_v10, %v555_v20  ;;  %v596_v6 = vadd.f32 1.0, %v969_v62 }
 0x11a   : > { %v973_v11 = vpop.eup %972  ;;  %v490_v13 = vmul.f32 0.6931472, %v971_v59  ;;  %v493_v16 = vmul.f32 %v957_v21, %v492_v49  ;;  %vm1507_vm12 = vcmp.lt.f32.partialorder %v494_v52, 0.0004427343  ;;  %v599_v26 = vmul.f32 -0.5, %v969_v62 }
 0x11b   : > { %v975_v61 = vpop.eup %974  ;;  %v526_v37 = vmul.f32 0.6931472, %v973_v11  ;;  %v529_v32 = vmul.f32 %v959_v14, %v528_v48  ;;  %v564_v35 = vadd.f32 1.0, %v563_v51  ;;  %978 = vlog2.f32 %v596_v6 }
 0x11c   : > { %v591_v8 = vadd.f32 1.0, %v590_v22  ;;  %v496_v38 = vsel %vm1507_vm12, %v493_v16, %v490_v13  ;;  %vm531_vm13 = vcmp.lt.f32.partialorder %v530_v63, 0.0004427343  ;;  %v566_v10 = vand.u32 2147483647, %v965_v4  ;;  %v638_v13 = vld [vmem:[#allocation2] sm:$0xff] }
 0x11d   : > { %v487_v44 = vsel %vm1483_vm9, %v484_v34, %v481_v57  ;;  %v523_v21 = vsel %vm1487_vm10, %v520_v45, %v517_v29  ;;  %v593_v20 = vand.u32 2147483647, %v1468_v47  ;;  %v532_v60 = vsel %vm531_vm13, %v529_v32, %v526_v37 }
 0x11e   : > { %v977_v49 = vpop.eup %976  ;;  %v559_v14 = vsel %vm1499_vm11, %v556_v3, %v553_v28  ;;  %v589_v52 = vmul.f32 0.6931472, %v975_v61  ;;  %v600_v56 = vadd.f32 1.0, %v599_v26  ;;  %v602_v48 = vand.u32 2147483647, %v969_v62 }
 0x11f   : > { %v608_v51 = vadd.f32 %v496_v38, %v384_v5  ;;  %v612_v22 = vadd.f32 %v532_v60, %v388_v42  ;;  %v562_v63 = vmul.f32 0.6931472, %v977_v49  ;;  %v565_v39 = vmul.f32 %v965_v4, %v564_v35 }
 0x120   : > { %v607_v34 = vadd.f32 %v487_v44, %v383_v50  ;;  %v592_v30 = vmul.f32 %v1468_v47, %v591_v8  ;;  %v392_v45 = vmax.f32 %v1431_v1, 0.0  ;;  %vm567_vm14 = vcmp.lt.f32.partialorder %v566_v10, 0.0004427343 }
 0x121   : > { %v979_v57 = vpop.eup %978  ;;  %v611_v33 = vadd.f32 %v523_v21, %v387_v54  ;;  %v615_v36 = vadd.f32 %v559_v14, %v391_v58  ;;  %vm1530_vm15 = vcmp.lt.f32.partialorder %v593_v20, 0.0004427343  ;;  %v568_v12 = vsel %vm567_vm14, %v565_v39, %v562_v63 }
 0x122   : > { %v595_v50 = vsel %vm1530_vm15, %v592_v30, %v589_v52  ;;  %v616_v47 = vadd.f32 %v568_v12, %v392_v45  ;;  %v598_v1 = vmul.f32 0.6931472, %v979_v57  ;;  %v601_v42 = vmul.f32 %v969_v62, %v600_v56 }
 0x123   : > { %v622_v4 = vadd.f32 %v608_v51, %v607_v34  ;;  %v624_v59 = vadd.f32 %v612_v22, %v611_v33  ;;  %v396_v17 = vmax.f32 %v1446_v24, 0.0  ;;  %vm603_vm0 = vcmp.lt.f32.partialorder %v602_v48, 0.0004427343 }
 0x124   : > { %v617_v27 = vadd.f32 %v577_v7, %v393_v15  ;;  %v621_v54 = vadd.f32 %v1453_v0, %v1384_v23  ;;  %v626_v58 = vadd.f32 %v616_v47, %v615_v36  ;;  %v604_v29 = vsel %vm603_vm0, %v601_v42, %v598_v1 }
 0x125   : > { %v623_v62 = vadd.f32 %v1465_v43, %v1394_v31  ;;  %v625_v24 = vadd.f32 %v1497_v46, %v1421_v53  ;;  %v619_v41 = vadd.f32 %v595_v50, %v395_v2  ;;  %v620_v19 = vadd.f32 %v604_v29, %v396_v17 }
 0x126   : > { %v627_v28 = vadd.f32 %v618_v40, %v617_v27  ;;  %v629_v3 = vadd.f32 %v622_v4, %v621_v54  ;;  %v639_v6 = vstv %s637_s23 }
 0x127   : > { %v630_v25 = vadd.f32 %v624_v59, %v623_v62  ;;  %v631_v15 = vadd.f32 %v626_v58, %v625_v24  ;;  %v628_v9 = vadd.f32 %v620_v19, %v619_v41 }
 0x129   : > { %v632_v23 = vadd.f32 %v628_v9, %v627_v28  ;;  %v633_v7 = vadd.f32 %v630_v25, %v629_v3 }
 0x12b   : > { %v634_v0 = vadd.f32 %v632_v23, %v631_v15 }
 0x12d   : > { %v635_v11 = vadd.f32 %v634_v0, %v633_v7 }
 0x12f   : > { %v640_v31 = vmul.f32 %v639_v6, %v635_v11  ;;  %646 = sbr.rel (%p791_p4) target bundleno = 316 (0x13c), region = 40 }
 0x131   : > { %v641_v43 = vadd.f32 %v640_v31, %v638_v13 }
 0x133   : > { %642 = vst [vmem:[#allocation2] sm:$0xff] %v641_v43 }
 0x13a   : > { %v647_v55 = vld [vmem:[#allocation2] sm:$0xff] }
 0x13b   : > { %648 = vst [vmem:[%s165_s18] sm:$0xff] %v647_v55 }
 0x13c PF: > { %s793_s24 = sshll.u32 %s1062_s13, 3  ;;  %s662_s3 = sshll.u32 %s165_s18, 4  ;;  %s663_s3 = int_to_ptr.vmem [resolvable:$true] %s662_s3 }
 0x13d   : > { %s660_s30 = scalar_lea.hbm %s1605_s2, %s793_s24  ;;  %s650_s4 = scalar_lea.sflag [#allocation4], %s163_s26 }
 0x13e   : > { %s664_s12 = sshll.u32 %s660_s30, 4  ;;  %s1000_s8 = scalar_lea.hbm %s1605_s2, 16  ;;  %s665_s12 = int_to_ptr.hbm [resolvable:$true] %s664_s12 }
 0x13f   : > { %s994_s5 = sshra.s32 %s665_s12, 4  ;;  %s995_s5 = int_to_ptr.hbm [resolvable:$true] %s994_s5 }
 0x140   : > { %s996_s6 = scalar_lea.hbm %s995_s5, 8  ;;  %p1001_p8 = scmp.lt.s32.totalorder %s995_s5, %s1605_s2 }
 0x141   : > { %p997_p5 = scmp.ne.s32.totalorder %s995_s5, %s996_s6  ;;  %p1002_p10 = scmp.lt.s32.totalorder %s1000_s8, %s996_s6 }
 0x143   : > { %p998_p6 = pnand %p997_p5, %p1141_p3  ;;  %p1003_p11 = por %p1002_p10, %p1001_p8 }
 0x145   : > { %p999_p7 = pneg %p998_p6 }
 0x147   : > { %p1004_p12 = pnand %p1003_p11, %p999_p7 }
 0x149   : > { %1007 = shalt.err (!%p1004_p12)
}
 0x14a   : > { %844 = dma.vmem_to_hbm [thread:$0]  (%p1141_p3), %s663_s3, 128, %s665_s12, %s650_s4  }
 0x14b PF: > { %p850_p13 = scmp.ge.s32.totalorder %s1074_s16, 2  ;;  %s676_s26 = sand.u32 1, %s1046_s9  }
 0x14c   : > { %s677_s28 = scalar_lea.sflag [#allocation4], %s676_s26 }
 0x14d   : > { %p847_p0 = pnand %p850_p13, %p1151_p9 }
 0x14f   : > { %p848_p1 = pneg %p847_p0 }
 0x151   : > { %1041 = dma.done.wait (%p848_p1), %s677_s28, 128  }
 0x152   : > { %1043 = vsyncadd (%p848_p1), %s677_s28, 4294967168  ;;  %s15_s16 = sadd.s32 1, %s1074_s16   ;;  %s1634_s9 = smov %s1050_s10 }
 0x153   : > { %p12_p2 = scmp.ge.s32.totalorder %s15_s16, 6   ;;  %s1635_s10 = smov %s1054_s11 }
 0x154   : > { %s1636_s11 = smov %s1159_s25  ;;  %s1637_s12 = smov %s1066_s14 }
 0x155   : > { %s1638_s13 = smov %s1070_s15  ;;  %s1639_s14 = smov %s1642_s19 }
 0x156   : > { %s1640_s15 = smov %s1646_s20  ;;  %14 = sbr.rel (!%p12_p2) target bundleno = 5 (0x5), region = 78 }
 0x15b   :  { %683 = vsyncpa [#allocation4], 1 }
 0x15c   :  { %685 = vsyncpa [#allocation4 + $0x1], 1 }

</bundles_post_ra>
